<compile_context>
chip_gen: v5e
topology: v5e:2x2
jax: 0.10.0
libtpu: 0.0.40
codegen_flags: <defaults>
</compile_context>

<pallas_src>
import functools

import jax
import jax.numpy as jnp
from jax.experimental import pallas as pl
from jax.experimental.pallas import tpu as pltpu

EPS = 1e-5  # nn.LayerNorm default eps


def _patch_merge_rows_kernel(rows_per_step, m_ref, gamma_ref, beta_ref, w_ref,
                             o_ref):
    """One grid step = `rows_per_step` independent merged rows.

    m_ref               : (R, 4C, Wh) f32  merged activations
    gamma_ref, beta_ref : (1, Wh)     f32  LayerNorm affine params
    w_ref               : (2C, 4C)    bf16/f32  1x1-conv weight
    o_ref               : (R, 2C, Wh) f32  output rows
    """
    c4, wh = m_ref.shape[1], m_ref.shape[2]
    # Hoist affine-parameter broadcasts and the weight load out of the loop.
    gamma = jnp.broadcast_to(gamma_ref[...], (c4, wh))
    beta = jnp.broadcast_to(beta_ref[...], (c4, wh))
    w = w_ref[...]

    for r in range(rows_per_step):                      # static unroll
        x = m_ref[r]                                    # (4C, Wh) f32
        # LayerNorm over the last axis, single-pass stats (biased variance).
        mean = jnp.mean(x, axis=-1, keepdims=True)
        mean_sq = jnp.mean(x * x, axis=-1, keepdims=True)
        var = mean_sq - mean * mean
        normed = (x - mean) * jax.lax.rsqrt(var + EPS)
        normed = normed * gamma + beta
        # 1x1 conv == channel matmul on the MXU, f32 accumulation.
        o_ref[r] = jnp.dot(w, normed.astype(w.dtype),
                           preferred_element_type=jnp.float32
                           ).astype(o_ref.dtype)


def _pick_rows_per_step(n_rows, c4, c2, wh,
                        r_max=8, vmem_budget_bytes=12 * 1024 * 1024):
    """Largest R <= r_max dividing n_rows whose double-buffered in/out blocks
    plus per-row temporaries fit a conservative VMEM budget (default scoped
    VMEM: 16 MiB on v5e, 32 MiB on v6e/v7x)."""
    per_row = 2 * (c4 + c2) * wh * 4          # 2x-buffered in + out blocks
    fixed = 4 * c4 * wh * 4 + c2 * c4 * 4     # per-row temporaries + weight
    best = 1
    for r in range(1, min(r_max, n_rows) + 1):
        if n_rows % r == 0 and fixed + r * per_row <= vmem_budget_bytes:
            best = r
    return best


@functools.partial(jax.jit, static_argnames=("matmul_dtype",))
def patch_merging(x, gamma, beta, w_red, *, matmul_dtype=jnp.bfloat16):
    """x: (B, C, H, W) float32 -> (B, 2C, H//2, W//2) float32."""
    B, C, H, W = x.shape
    assert H % 2 == 0 and W % 2 == 0, f"x size ({H}*{W}) are not even."
    Hh, Wh = H // 2, W // 2
    # nn.LayerNorm(4*dim) normalizes the last (W//2) axis of the NCHW tensor,
    # so its parameter length 4*dim must equal W//2 (module-level constraint).
    assert Wh == 4 * C, "LayerNorm(4*dim) requires W//2 == 4*dim in this module"

    # --- 2x2 strided patch gather, built directly in kernel layout --------
    x0 = x[:, :, 0::2, 0::2]
    x1 = x[:, :, 1::2, 0::2]
    x2 = x[:, :, 0::2, 1::2]
    x3 = x[:, :, 1::2, 1::2]
    # (B, Hh, 4C, Wh) in PyTorch channel order, then flatten rows. The slices,
    # transposes and concat fuse into one XLA copy; the final reshape is free.
    merged = jnp.concatenate(
        [t.transpose(0, 2, 1, 3) for t in (x0, x1, x2, x3)], axis=2
    ).reshape(B * Hh, 4 * C, Wh).astype(jnp.float32)

    gamma2 = gamma.reshape(1, Wh).astype(jnp.float32)
    beta2 = beta.reshape(1, Wh).astype(jnp.float32)
    w2 = w_red.reshape(2 * C, 4 * C).astype(matmul_dtype)   # squeeze 1x1 conv

    n_rows = B * Hh
    R = _pick_rows_per_step(n_rows, 4 * C, 2 * C, Wh)
    kernel = functools.partial(_patch_merge_rows_kernel, R)

    out = pl.pallas_call(
        kernel,
        out_shape=jax.ShapeDtypeStruct((n_rows, 2 * C, Wh), jnp.float32),
        grid=(n_rows // R,),
        in_specs=[
            pl.BlockSpec((R, 4 * C, Wh), lambda i: (i, 0, 0)),
            pl.BlockSpec((1, Wh), lambda i: (0, 0)),        # gamma (resident)
            pl.BlockSpec((1, Wh), lambda i: (0, 0)),        # beta  (resident)
            pl.BlockSpec((2 * C, 4 * C), lambda i: (0, 0)),  # weight (resident)
        ],
        out_specs=pl.BlockSpec((R, 2 * C, Wh), lambda i: (i, 0, 0)),
        compiler_params=pltpu.CompilerParams(
            dimension_semantics=("parallel",)),
    )(merged, gamma2, beta2, w2)

    # Back to NCHW. TODO(synk): could be folded into the kernel's out_specs
    # with a (1, 2C, R, Wh) block + sublane-indexed stores.
    return out.reshape(B, Hh, 2 * C, Wh).transpose(0, 2, 1, 3)


def patch_merging_ref(x, gamma, beta, w_red):
    """Pure-JAX reference mirroring the PyTorch forward (f32 end to end)."""
    B, C, H, W = x.shape
    x0 = x[:, :, 0::2, 0::2]
    x1 = x[:, :, 1::2, 0::2]
    x2 = x[:, :, 0::2, 1::2]
    x3 = x[:, :, 1::2, 1::2]
    m = jnp.concatenate([x0, x1, x2, x3], axis=1)               # (B, 4C, Hh, Wh)
    mean = jnp.mean(m, axis=-1, keepdims=True)
    var = jnp.mean((m - mean) ** 2, axis=-1, keepdims=True)
    n = (m - mean) / jnp.sqrt(var + EPS) * gamma + beta
    w2 = w_red.reshape(2 * C, 4 * C)
    return jnp.einsum("oc,bchw->bohw", w2, n)


if __name__ == "__main__":
    dim = 4
    B, C, H, W = 2, dim, 16, 8 * dim   # W//2 == 4*dim as the module requires
    key = jax.random.PRNGKey(0)
    kx, kg, kb, kw = jax.random.split(key, 4)

    x = jax.random.normal(kx, (B, C, H, W), dtype=jnp.float32)
    gamma = 1.0 + 0.1 * jax.random.normal(kg, (4 * dim,), dtype=jnp.float32)
    beta = 0.1 * jax.random.normal(kb, (4 * dim,), dtype=jnp.float32)
    w_red = 0.1 * jax.random.normal(kw, (2 * dim, 4 * dim, 1, 1),
                                    dtype=jnp.float32)

    ref = patch_merging_ref(x, gamma, beta, w_red)

    # Tight structural check with an f32 MXU matmul.
    out_f32 = jax.block_until_ready(
        patch_merging(x, gamma, beta, w_red, matmul_dtype=jnp.float32))
    assert out_f32.shape == (B, 2 * dim, H // 2, W // 2), out_f32.shape
    assert jnp.allclose(out_f32, ref, atol=1e-4, rtol=1e-4), \
        "f32 kernel mismatch vs reference"

    # Default perf path: bf16 MXU operands, f32 LayerNorm stats + accumulation.
    out_bf16 = jax.block_until_ready(patch_merging(x, gamma, beta, w_red))
    assert out_bf16.shape == (B, 2 * dim, H // 2, W // 2), out_bf16.shape
    assert jnp.allclose(out_bf16, ref, atol=2e-2, rtol=2e-2), \
        "bf16 kernel mismatch vs reference"

    print("KERNEL_OK")
</pallas_src>

<mosaic_0001>
module attributes {stable_mosaic.version = 11 : i64} {
  func.func @_patch_merge_rows_kernel(%arg0: i32, %arg1: memref<8x16x16xf32, #tpu.memory_space<vmem>>, %arg2: memref<1x16xf32, #tpu.memory_space<vmem>>, %arg3: memref<1x16xf32, #tpu.memory_space<vmem>>, %arg4: memref<8x16xf32, #tpu.memory_space<vmem>>, %arg5: memref<8x8x16xf32, #tpu.memory_space<vmem>>) attributes {dimension_semantics = [#tpu.dimension_semantics<parallel>], iteration_bounds = array<i64: 2>, scalar_prefetch = 0 : i64, scratch_operands = 0 : i64, tpu.core_type = #tpu.core_type<tc>, window_params = [{transform_indices = @transform_0, window_bounds = array<i64: 8, 16, 16>}, {pipeline_mode = #tpu.pipeline_mode<synchronous>, transform_indices = @transform_1, window_bounds = array<i64: 1, 16>}, {pipeline_mode = #tpu.pipeline_mode<synchronous>, transform_indices = @transform_2, window_bounds = array<i64: 1, 16>}, {pipeline_mode = #tpu.pipeline_mode<synchronous>, transform_indices = @transform_3, window_bounds = array<i64: 8, 16>}, {transform_indices = @transform_4, window_bounds = array<i64: 8, 8, 16>}]} {
    %c0 = arith.constant 0 : index
    %c0_0 = arith.constant 0 : index
    %0 = vector.load %arg2[%c0, %c0_0] : memref<1x16xf32, #tpu.memory_space<vmem>>, vector<1x16xf32>
    %1 = vector.shape_cast %0 : vector<1x16xf32> to vector<1x16xf32>
    %2 = vector.broadcast %1 : vector<1x16xf32> to vector<16x16xf32>
    %c0_1 = arith.constant 0 : index
    %c0_2 = arith.constant 0 : index
    %3 = vector.load %arg3[%c0_1, %c0_2] : memref<1x16xf32, #tpu.memory_space<vmem>>, vector<1x16xf32>
    %4 = vector.shape_cast %3 : vector<1x16xf32> to vector<1x16xf32>
    %5 = vector.broadcast %4 : vector<1x16xf32> to vector<16x16xf32>
    %c0_3 = arith.constant 0 : index
    %c0_4 = arith.constant 0 : index
    %6 = vector.load %arg4[%c0_3, %c0_4] : memref<8x16xf32, #tpu.memory_space<vmem>>, vector<8x16xf32>
    %c0_5 = arith.constant 0 : index
    %c0_6 = arith.constant 0 : index
    %c0_7 = arith.constant 0 : index
    %7 = vector.load %arg1[%c0_5, %c0_6, %c0_7] : memref<8x16x16xf32, #tpu.memory_space<vmem>>, vector<1x16x16xf32>
    %8 = vector.shape_cast %7 : vector<1x16x16xf32> to vector<16x16xf32>
    %cst = arith.constant dense<0.000000e+00> : vector<16xf32>
    %9 = vector.multi_reduction <add>, %8, %cst [1] : vector<16x16xf32> to vector<16xf32>
    %10 = vector.shape_cast %9 : vector<16xf32> to vector<16x1xf32>
    %cst_8 = arith.constant 1.600000e+01 : f32
    %11 = vector.broadcast %cst_8 : f32 to vector<16x1xf32>
    %12 = arith.divf %10, %11 : vector<16x1xf32>
    %13 = arith.mulf %8, %8 : vector<16x16xf32>
    %cst_9 = arith.constant dense<0.000000e+00> : vector<16xf32>
    %14 = vector.multi_reduction <add>, %13, %cst_9 [1] : vector<16x16xf32> to vector<16xf32>
    %15 = vector.shape_cast %14 : vector<16xf32> to vector<16x1xf32>
    %cst_10 = arith.constant 1.600000e+01 : f32
    %16 = vector.broadcast %cst_10 : f32 to vector<16x1xf32>
    %17 = arith.divf %15, %16 : vector<16x1xf32>
    %18 = arith.mulf %12, %12 : vector<16x1xf32>
    %19 = arith.subf %17, %18 : vector<16x1xf32>
    %20 = vector.broadcast %12 : vector<16x1xf32> to vector<16x16xf32>
    %21 = arith.subf %8, %20 : vector<16x16xf32>
    %cst_11 = arith.constant 9.99999974E-6 : f32
    %22 = vector.broadcast %cst_11 : f32 to vector<16x1xf32>
    %23 = arith.addf %19, %22 : vector<16x1xf32>
    %24 = math.rsqrt %23 : vector<16x1xf32>
    %25 = vector.broadcast %24 : vector<16x1xf32> to vector<16x16xf32>
    %26 = arith.mulf %21, %25 : vector<16x16xf32>
    %27 = arith.mulf %26, %2 : vector<16x16xf32>
    %28 = arith.addf %27, %5 : vector<16x16xf32>
    %cst_12 = arith.constant dense<0.000000e+00> : vector<8x16xf32>
    %29 = tpu.matmul %6, %28, %cst_12 {dimension_numbers = #tpu.dot_dimension_numbers<[1], [0], [0], [1], [0, 0, 1, 1], [], []>} : vector<8x16xf32>, vector<16x16xf32>, vector<8x16xf32> -> vector<8x16xf32>
    %c0_13 = arith.constant 0 : index
    %c0_14 = arith.constant 0 : index
    %c0_15 = arith.constant 0 : index
    %30 = vector.load %arg5[%c0_13, %c0_14, %c0_15] : memref<8x8x16xf32, #tpu.memory_space<vmem>>, vector<1x8x16xf32>
    %31 = vector.shape_cast %30 : vector<1x8x16xf32> to vector<8x16xf32>
    %32 = vector.shape_cast %29 : vector<8x16xf32> to vector<1x8x16xf32>
    tpu.vector_store %arg5[%c0_13, %c0_14, %c0_15], %32 {strides = array<i32>} : memref<8x8x16xf32, #tpu.memory_space<vmem>>, vector<1x8x16xf32>,
    %c1 = arith.constant 1 : index
    %c0_16 = arith.constant 0 : index
    %c0_17 = arith.constant 0 : index
    %33 = vector.load %arg1[%c1, %c0_16, %c0_17] : memref<8x16x16xf32, #tpu.memory_space<vmem>>, vector<1x16x16xf32>
    %34 = vector.shape_cast %33 : vector<1x16x16xf32> to vector<16x16xf32>
    %cst_18 = arith.constant dense<0.000000e+00> : vector<16xf32>
    %35 = vector.multi_reduction <add>, %34, %cst_18 [1] : vector<16x16xf32> to vector<16xf32>
    %36 = vector.shape_cast %35 : vector<16xf32> to vector<16x1xf32>
    %cst_19 = arith.constant 1.600000e+01 : f32
    %37 = vector.broadcast %cst_19 : f32 to vector<16x1xf32>
    %38 = arith.divf %36, %37 : vector<16x1xf32>
    %39 = arith.mulf %34, %34 : vector<16x16xf32>
    %cst_20 = arith.constant dense<0.000000e+00> : vector<16xf32>
    %40 = vector.multi_reduction <add>, %39, %cst_20 [1] : vector<16x16xf32> to vector<16xf32>
    %41 = vector.shape_cast %40 : vector<16xf32> to vector<16x1xf32>
    %cst_21 = arith.constant 1.600000e+01 : f32
    %42 = vector.broadcast %cst_21 : f32 to vector<16x1xf32>
    %43 = arith.divf %41, %42 : vector<16x1xf32>
    %44 = arith.mulf %38, %38 : vector<16x1xf32>
    %45 = arith.subf %43, %44 : vector<16x1xf32>
    %46 = vector.broadcast %38 : vector<16x1xf32> to vector<16x16xf32>
    %47 = arith.subf %34, %46 : vector<16x16xf32>
    %cst_22 = arith.constant 9.99999974E-6 : f32
    %48 = vector.broadcast %cst_22 : f32 to vector<16x1xf32>
    %49 = arith.addf %45, %48 : vector<16x1xf32>
    %50 = math.rsqrt %49 : vector<16x1xf32>
    %51 = vector.broadcast %50 : vector<16x1xf32> to vector<16x16xf32>
    %52 = arith.mulf %47, %51 : vector<16x16xf32>
    %53 = arith.mulf %52, %2 : vector<16x16xf32>
    %54 = arith.addf %53, %5 : vector<16x16xf32>
    %cst_23 = arith.constant dense<0.000000e+00> : vector<8x16xf32>
    %55 = tpu.matmul %6, %54, %cst_23 {dimension_numbers = #tpu.dot_dimension_numbers<[1], [0], [0], [1], [0, 0, 1, 1], [], []>} : vector<8x16xf32>, vector<16x16xf32>, vector<8x16xf32> -> vector<8x16xf32>
    %c1_24 = arith.constant 1 : index
    %c0_25 = arith.constant 0 : index
    %c0_26 = arith.constant 0 : index
    %56 = vector.load %arg5[%c1_24, %c0_25, %c0_26] : memref<8x8x16xf32, #tpu.memory_space<vmem>>, vector<1x8x16xf32>
    %57 = vector.shape_cast %56 : vector<1x8x16xf32> to vector<8x16xf32>
    %58 = vector.shape_cast %55 : vector<8x16xf32> to vector<1x8x16xf32>
    tpu.vector_store %arg5[%c1_24, %c0_25, %c0_26], %58 {strides = array<i32>} : memref<8x8x16xf32, #tpu.memory_space<vmem>>, vector<1x8x16xf32>,
    %c2 = arith.constant 2 : index
    %c0_27 = arith.constant 0 : index
    %c0_28 = arith.constant 0 : index
    %59 = vector.load %arg1[%c2, %c0_27, %c0_28] : memref<8x16x16xf32, #tpu.memory_space<vmem>>, vector<1x16x16xf32>
    %60 = vector.shape_cast %59 : vector<1x16x16xf32> to vector<16x16xf32>
    %cst_29 = arith.constant dense<0.000000e+00> : vector<16xf32>
    %61 = vector.multi_reduction <add>, %60, %cst_29 [1] : vector<16x16xf32> to vector<16xf32>
    %62 = vector.shape_cast %61 : vector<16xf32> to vector<16x1xf32>
    %cst_30 = arith.constant 1.600000e+01 : f32
    %63 = vector.broadcast %cst_30 : f32 to vector<16x1xf32>
    %64 = arith.divf %62, %63 : vector<16x1xf32>
    %65 = arith.mulf %60, %60 : vector<16x16xf32>
    %cst_31 = arith.constant dense<0.000000e+00> : vector<16xf32>
    %66 = vector.multi_reduction <add>, %65, %cst_31 [1] : vector<16x16xf32> to vector<16xf32>
    %67 = vector.shape_cast %66 : vector<16xf32> to vector<16x1xf32>
    %cst_32 = arith.constant 1.600000e+01 : f32
    %68 = vector.broadcast %cst_32 : f32 to vector<16x1xf32>
    %69 = arith.divf %67, %68 : vector<16x1xf32>
    %70 = arith.mulf %64, %64 : vector<16x1xf32>
    %71 = arith.subf %69, %70 : vector<16x1xf32>
    %72 = vector.broadcast %64 : vector<16x1xf32> to vector<16x16xf32>
    %73 = arith.subf %60, %72 : vector<16x16xf32>
    %cst_33 = arith.constant 9.99999974E-6 : f32
    %74 = vector.broadcast %cst_33 : f32 to vector<16x1xf32>
    %75 = arith.addf %71, %74 : vector<16x1xf32>
    %76 = math.rsqrt %75 : vector<16x1xf32>
    %77 = vector.broadcast %76 : vector<16x1xf32> to vector<16x16xf32>
    %78 = arith.mulf %73, %77 : vector<16x16xf32>
    %79 = arith.mulf %78, %2 : vector<16x16xf32>
    %80 = arith.addf %79, %5 : vector<16x16xf32>
    %cst_34 = arith.constant dense<0.000000e+00> : vector<8x16xf32>
    %81 = tpu.matmul %6, %80, %cst_34 {dimension_numbers = #tpu.dot_dimension_numbers<[1], [0], [0], [1], [0, 0, 1, 1], [], []>} : vector<8x16xf32>, vector<16x16xf32>, vector<8x16xf32> -> vector<8x16xf32>
    %c2_35 = arith.constant 2 : index
    %c0_36 = arith.constant 0 : index
    %c0_37 = arith.constant 0 : index
    %82 = vector.load %arg5[%c2_35, %c0_36, %c0_37] : memref<8x8x16xf32, #tpu.memory_space<vmem>>, vector<1x8x16xf32>
    %83 = vector.shape_cast %82 : vector<1x8x16xf32> to vector<8x16xf32>
    %84 = vector.shape_cast %81 : vector<8x16xf32> to vector<1x8x16xf32>
    tpu.vector_store %arg5[%c2_35, %c0_36, %c0_37], %84 {strides = array<i32>} : memref<8x8x16xf32, #tpu.memory_space<vmem>>, vector<1x8x16xf32>,
    %c3 = arith.constant 3 : index
    %c0_38 = arith.constant 0 : index
    %c0_39 = arith.constant 0 : index
    %85 = vector.load %arg1[%c3, %c0_38, %c0_39] : memref<8x16x16xf32, #tpu.memory_space<vmem>>, vector<1x16x16xf32>
    %86 = vector.shape_cast %85 : vector<1x16x16xf32> to vector<16x16xf32>
    %cst_40 = arith.constant dense<0.000000e+00> : vector<16xf32>
    %87 = vector.multi_reduction <add>, %86, %cst_40 [1] : vector<16x16xf32> to vector<16xf32>
    %88 = vector.shape_cast %87 : vector<16xf32> to vector<16x1xf32>
    %cst_41 = arith.constant 1.600000e+01 : f32
    %89 = vector.broadcast %cst_41 : f32 to vector<16x1xf32>
    %90 = arith.divf %88, %89 : vector<16x1xf32>
    %91 = arith.mulf %86, %86 : vector<16x16xf32>
    %cst_42 = arith.constant dense<0.000000e+00> : vector<16xf32>
    %92 = vector.multi_reduction <add>, %91, %cst_42 [1] : vector<16x16xf32> to vector<16xf32>
    %93 = vector.shape_cast %92 : vector<16xf32> to vector<16x1xf32>
    %cst_43 = arith.constant 1.600000e+01 : f32
    %94 = vector.broadcast %cst_43 : f32 to vector<16x1xf32>
    %95 = arith.divf %93, %94 : vector<16x1xf32>
    %96 = arith.mulf %90, %90 : vector<16x1xf32>
    %97 = arith.subf %95, %96 : vector<16x1xf32>
    %98 = vector.broadcast %90 : vector<16x1xf32> to vector<16x16xf32>
    %99 = arith.subf %86, %98 : vector<16x16xf32>
    %cst_44 = arith.constant 9.99999974E-6 : f32
    %100 = vector.broadcast %cst_44 : f32 to vector<16x1xf32>
    %101 = arith.addf %97, %100 : vector<16x1xf32>
    %102 = math.rsqrt %101 : vector<16x1xf32>
    %103 = vector.broadcast %102 : vector<16x1xf32> to vector<16x16xf32>
    %104 = arith.mulf %99, %103 : vector<16x16xf32>
    %105 = arith.mulf %104, %2 : vector<16x16xf32>
    %106 = arith.addf %105, %5 : vector<16x16xf32>
    %cst_45 = arith.constant dense<0.000000e+00> : vector<8x16xf32>
    %107 = tpu.matmul %6, %106, %cst_45 {dimension_numbers = #tpu.dot_dimension_numbers<[1], [0], [0], [1], [0, 0, 1, 1], [], []>} : vector<8x16xf32>, vector<16x16xf32>, vector<8x16xf32> -> vector<8x16xf32>
    %c3_46 = arith.constant 3 : index
    %c0_47 = arith.constant 0 : index
    %c0_48 = arith.constant 0 : index
    %108 = vector.load %arg5[%c3_46, %c0_47, %c0_48] : memref<8x8x16xf32, #tpu.memory_space<vmem>>, vector<1x8x16xf32>
    %109 = vector.shape_cast %108 : vector<1x8x16xf32> to vector<8x16xf32>
    %110 = vector.shape_cast %107 : vector<8x16xf32> to vector<1x8x16xf32>
    tpu.vector_store %arg5[%c3_46, %c0_47, %c0_48], %110 {strides = array<i32>} : memref<8x8x16xf32, #tpu.memory_space<vmem>>, vector<1x8x16xf32>,
    %c4 = arith.constant 4 : index
    %c0_49 = arith.constant 0 : index
    %c0_50 = arith.constant 0 : index
    %111 = vector.load %arg1[%c4, %c0_49, %c0_50] : memref<8x16x16xf32, #tpu.memory_space<vmem>>, vector<1x16x16xf32>
    %112 = vector.shape_cast %111 : vector<1x16x16xf32> to vector<16x16xf32>
    %cst_51 = arith.constant dense<0.000000e+00> : vector<16xf32>
    %113 = vector.multi_reduction <add>, %112, %cst_51 [1] : vector<16x16xf32> to vector<16xf32>
    %114 = vector.shape_cast %113 : vector<16xf32> to vector<16x1xf32>
    %cst_52 = arith.constant 1.600000e+01 : f32
    %115 = vector.broadcast %cst_52 : f32 to vector<16x1xf32>
    %116 = arith.divf %114, %115 : vector<16x1xf32>
    %117 = arith.mulf %112, %112 : vector<16x16xf32>
    %cst_53 = arith.constant dense<0.000000e+00> : vector<16xf32>
    %118 = vector.multi_reduction <add>, %117, %cst_53 [1] : vector<16x16xf32> to vector<16xf32>
    %119 = vector.shape_cast %118 : vector<16xf32> to vector<16x1xf32>
    %cst_54 = arith.constant 1.600000e+01 : f32
    %120 = vector.broadcast %cst_54 : f32 to vector<16x1xf32>
    %121 = arith.divf %119, %120 : vector<16x1xf32>
    %122 = arith.mulf %116, %116 : vector<16x1xf32>
    %123 = arith.subf %121, %122 : vector<16x1xf32>
    %124 = vector.broadcast %116 : vector<16x1xf32> to vector<16x16xf32>
    %125 = arith.subf %112, %124 : vector<16x16xf32>
    %cst_55 = arith.constant 9.99999974E-6 : f32
    %126 = vector.broadcast %cst_55 : f32 to vector<16x1xf32>
    %127 = arith.addf %123, %126 : vector<16x1xf32>
    %128 = math.rsqrt %127 : vector<16x1xf32>
    %129 = vector.broadcast %128 : vector<16x1xf32> to vector<16x16xf32>
    %130 = arith.mulf %125, %129 : vector<16x16xf32>
    %131 = arith.mulf %130, %2 : vector<16x16xf32>
    %132 = arith.addf %131, %5 : vector<16x16xf32>
    %cst_56 = arith.constant dense<0.000000e+00> : vector<8x16xf32>
    %133 = tpu.matmul %6, %132, %cst_56 {dimension_numbers = #tpu.dot_dimension_numbers<[1], [0], [0], [1], [0, 0, 1, 1], [], []>} : vector<8x16xf32>, vector<16x16xf32>, vector<8x16xf32> -> vector<8x16xf32>
    %c4_57 = arith.constant 4 : index
    %c0_58 = arith.constant 0 : index
    %c0_59 = arith.constant 0 : index
    %134 = vector.load %arg5[%c4_57, %c0_58, %c0_59] : memref<8x8x16xf32, #tpu.memory_space<vmem>>, vector<1x8x16xf32>
    %135 = vector.shape_cast %134 : vector<1x8x16xf32> to vector<8x16xf32>
    %136 = vector.shape_cast %133 : vector<8x16xf32> to vector<1x8x16xf32>
    tpu.vector_store %arg5[%c4_57, %c0_58, %c0_59], %136 {strides = array<i32>} : memref<8x8x16xf32, #tpu.memory_space<vmem>>, vector<1x8x16xf32>,
    %c5 = arith.constant 5 : index
    %c0_60 = arith.constant 0 : index
    %c0_61 = arith.constant 0 : index
    %137 = vector.load %arg1[%c5, %c0_60, %c0_61] : memref<8x16x16xf32, #tpu.memory_space<vmem>>, vector<1x16x16xf32>
    %138 = vector.shape_cast %137 : vector<1x16x16xf32> to vector<16x16xf32>
    %cst_62 = arith.constant dense<0.000000e+00> : vector<16xf32>
    %139 = vector.multi_reduction <add>, %138, %cst_62 [1] : vector<16x16xf32> to vector<16xf32>
    %140 = vector.shape_cast %139 : vector<16xf32> to vector<16x1xf32>
    %cst_63 = arith.constant 1.600000e+01 : f32
    %141 = vector.broadcast %cst_63 : f32 to vector<16x1xf32>
    %142 = arith.divf %140, %141 : vector<16x1xf32>
    %143 = arith.mulf %138, %138 : vector<16x16xf32>
    %cst_64 = arith.constant dense<0.000000e+00> : vector<16xf32>
    %144 = vector.multi_reduction <add>, %143, %cst_64 [1] : vector<16x16xf32> to vector<16xf32>
    %145 = vector.shape_cast %144 : vector<16xf32> to vector<16x1xf32>
    %cst_65 = arith.constant 1.600000e+01 : f32
    %146 = vector.broadcast %cst_65 : f32 to vector<16x1xf32>
    %147 = arith.divf %145, %146 : vector<16x1xf32>
    %148 = arith.mulf %142, %142 : vector<16x1xf32>
    %149 = arith.subf %147, %148 : vector<16x1xf32>
    %150 = vector.broadcast %142 : vector<16x1xf32> to vector<16x16xf32>
    %151 = arith.subf %138, %150 : vector<16x16xf32>
    %cst_66 = arith.constant 9.99999974E-6 : f32
    %152 = vector.broadcast %cst_66 : f32 to vector<16x1xf32>
    %153 = arith.addf %149, %152 : vector<16x1xf32>
    %154 = math.rsqrt %153 : vector<16x1xf32>
    %155 = vector.broadcast %154 : vector<16x1xf32> to vector<16x16xf32>
    %156 = arith.mulf %151, %155 : vector<16x16xf32>
    %157 = arith.mulf %156, %2 : vector<16x16xf32>
    %158 = arith.addf %157, %5 : vector<16x16xf32>
    %cst_67 = arith.constant dense<0.000000e+00> : vector<8x16xf32>
    %159 = tpu.matmul %6, %158, %cst_67 {dimension_numbers = #tpu.dot_dimension_numbers<[1], [0], [0], [1], [0, 0, 1, 1], [], []>} : vector<8x16xf32>, vector<16x16xf32>, vector<8x16xf32> -> vector<8x16xf32>
    %c5_68 = arith.constant 5 : index
    %c0_69 = arith.constant 0 : index
    %c0_70 = arith.constant 0 : index
    %160 = vector.load %arg5[%c5_68, %c0_69, %c0_70] : memref<8x8x16xf32, #tpu.memory_space<vmem>>, vector<1x8x16xf32>
    %161 = vector.shape_cast %160 : vector<1x8x16xf32> to vector<8x16xf32>
    %162 = vector.shape_cast %159 : vector<8x16xf32> to vector<1x8x16xf32>
    tpu.vector_store %arg5[%c5_68, %c0_69, %c0_70], %162 {strides = array<i32>} : memref<8x8x16xf32, #tpu.memory_space<vmem>>, vector<1x8x16xf32>,
    %c6 = arith.constant 6 : index
    %c0_71 = arith.constant 0 : index
    %c0_72 = arith.constant 0 : index
    %163 = vector.load %arg1[%c6, %c0_71, %c0_72] : memref<8x16x16xf32, #tpu.memory_space<vmem>>, vector<1x16x16xf32>
    %164 = vector.shape_cast %163 : vector<1x16x16xf32> to vector<16x16xf32>
    %cst_73 = arith.constant dense<0.000000e+00> : vector<16xf32>
    %165 = vector.multi_reduction <add>, %164, %cst_73 [1] : vector<16x16xf32> to vector<16xf32>
    %166 = vector.shape_cast %165 : vector<16xf32> to vector<16x1xf32>
    %cst_74 = arith.constant 1.600000e+01 : f32
    %167 = vector.broadcast %cst_74 : f32 to vector<16x1xf32>
    %168 = arith.divf %166, %167 : vector<16x1xf32>
    %169 = arith.mulf %164, %164 : vector<16x16xf32>
    %cst_75 = arith.constant dense<0.000000e+00> : vector<16xf32>
    %170 = vector.multi_reduction <add>, %169, %cst_75 [1] : vector<16x16xf32> to vector<16xf32>
    %171 = vector.shape_cast %170 : vector<16xf32> to vector<16x1xf32>
    %cst_76 = arith.constant 1.600000e+01 : f32
    %172 = vector.broadcast %cst_76 : f32 to vector<16x1xf32>
    %173 = arith.divf %171, %172 : vector<16x1xf32>
    %174 = arith.mulf %168, %168 : vector<16x1xf32>
    %175 = arith.subf %173, %174 : vector<16x1xf32>
    %176 = vector.broadcast %168 : vector<16x1xf32> to vector<16x16xf32>
    %177 = arith.subf %164, %176 : vector<16x16xf32>
    %cst_77 = arith.constant 9.99999974E-6 : f32
    %178 = vector.broadcast %cst_77 : f32 to vector<16x1xf32>
    %179 = arith.addf %175, %178 : vector<16x1xf32>
    %180 = math.rsqrt %179 : vector<16x1xf32>
    %181 = vector.broadcast %180 : vector<16x1xf32> to vector<16x16xf32>
    %182 = arith.mulf %177, %181 : vector<16x16xf32>
    %183 = arith.mulf %182, %2 : vector<16x16xf32>
    %184 = arith.addf %183, %5 : vector<16x16xf32>
    %cst_78 = arith.constant dense<0.000000e+00> : vector<8x16xf32>
    %185 = tpu.matmul %6, %184, %cst_78 {dimension_numbers = #tpu.dot_dimension_numbers<[1], [0], [0], [1], [0, 0, 1, 1], [], []>} : vector<8x16xf32>, vector<16x16xf32>, vector<8x16xf32> -> vector<8x16xf32>
    %c6_79 = arith.constant 6 : index
    %c0_80 = arith.constant 0 : index
    %c0_81 = arith.constant 0 : index
    %186 = vector.load %arg5[%c6_79, %c0_80, %c0_81] : memref<8x8x16xf32, #tpu.memory_space<vmem>>, vector<1x8x16xf32>
    %187 = vector.shape_cast %186 : vector<1x8x16xf32> to vector<8x16xf32>
    %188 = vector.shape_cast %185 : vector<8x16xf32> to vector<1x8x16xf32>
    tpu.vector_store %arg5[%c6_79, %c0_80, %c0_81], %188 {strides = array<i32>} : memref<8x8x16xf32, #tpu.memory_space<vmem>>, vector<1x8x16xf32>,
    %c7 = arith.constant 7 : index
    %c0_82 = arith.constant 0 : index
    %c0_83 = arith.constant 0 : index
    %189 = vector.load %arg1[%c7, %c0_82, %c0_83] : memref<8x16x16xf32, #tpu.memory_space<vmem>>, vector<1x16x16xf32>
    %190 = vector.shape_cast %189 : vector<1x16x16xf32> to vector<16x16xf32>
    %cst_84 = arith.constant dense<0.000000e+00> : vector<16xf32>
    %191 = vector.multi_reduction <add>, %190, %cst_84 [1] : vector<16x16xf32> to vector<16xf32>
    %192 = vector.shape_cast %191 : vector<16xf32> to vector<16x1xf32>
    %cst_85 = arith.constant 1.600000e+01 : f32
    %193 = vector.broadcast %cst_85 : f32 to vector<16x1xf32>
    %194 = arith.divf %192, %193 : vector<16x1xf32>
    %195 = arith.mulf %190, %190 : vector<16x16xf32>
    %cst_86 = arith.constant dense<0.000000e+00> : vector<16xf32>
    %196 = vector.multi_reduction <add>, %195, %cst_86 [1] : vector<16x16xf32> to vector<16xf32>
    %197 = vector.shape_cast %196 : vector<16xf32> to vector<16x1xf32>
    %cst_87 = arith.constant 1.600000e+01 : f32
    %198 = vector.broadcast %cst_87 : f32 to vector<16x1xf32>
    %199 = arith.divf %197, %198 : vector<16x1xf32>
    %200 = arith.mulf %194, %194 : vector<16x1xf32>
    %201 = arith.subf %199, %200 : vector<16x1xf32>
    %202 = vector.broadcast %194 : vector<16x1xf32> to vector<16x16xf32>
    %203 = arith.subf %190, %202 : vector<16x16xf32>
    %cst_88 = arith.constant 9.99999974E-6 : f32
    %204 = vector.broadcast %cst_88 : f32 to vector<16x1xf32>
    %205 = arith.addf %201, %204 : vector<16x1xf32>
    %206 = math.rsqrt %205 : vector<16x1xf32>
    %207 = vector.broadcast %206 : vector<16x1xf32> to vector<16x16xf32>
    %208 = arith.mulf %203, %207 : vector<16x16xf32>
    %209 = arith.mulf %208, %2 : vector<16x16xf32>
    %210 = arith.addf %209, %5 : vector<16x16xf32>
    %cst_89 = arith.constant dense<0.000000e+00> : vector<8x16xf32>
    %211 = tpu.matmul %6, %210, %cst_89 {dimension_numbers = #tpu.dot_dimension_numbers<[1], [0], [0], [1], [0, 0, 1, 1], [], []>} : vector<8x16xf32>, vector<16x16xf32>, vector<8x16xf32> -> vector<8x16xf32>
    %c7_90 = arith.constant 7 : index
    %c0_91 = arith.constant 0 : index
    %c0_92 = arith.constant 0 : index
    %212 = vector.load %arg5[%c7_90, %c0_91, %c0_92] : memref<8x8x16xf32, #tpu.memory_space<vmem>>, vector<1x8x16xf32>
    %213 = vector.shape_cast %212 : vector<1x8x16xf32> to vector<8x16xf32>
    %214 = vector.shape_cast %211 : vector<8x16xf32> to vector<1x8x16xf32>
    tpu.vector_store %arg5[%c7_90, %c0_91, %c0_92], %214 {strides = array<i32>} : memref<8x8x16xf32, #tpu.memory_space<vmem>>, vector<1x8x16xf32>,
    return
  }
  func.func @transform_0(%arg0: i32) -> (i32, i32, i32) {
    %c0_i32 = arith.constant 0 : i32
    %c0_i32_0 = arith.constant 0 : i32
    %c0_i32_1 = arith.constant 0 : i32
    return %arg0, %c0_i32, %c0_i32_0 : i32, i32, i32
  }
  func.func @transform_1(%arg0: i32) -> (i32, i32) {
    %c0_i32 = arith.constant 0 : i32
    %c0_i32_0 = arith.constant 0 : i32
    %c0_i32_1 = arith.constant 0 : i32
    return %c0_i32, %c0_i32_0 : i32, i32
  }
  func.func @transform_2(%arg0: i32) -> (i32, i32) {
    %c0_i32 = arith.constant 0 : i32
    %c0_i32_0 = arith.constant 0 : i32
    %c0_i32_1 = arith.constant 0 : i32
    return %c0_i32, %c0_i32_0 : i32, i32
  }
  func.func @transform_3(%arg0: i32) -> (i32, i32) {
    %c0_i32 = arith.constant 0 : i32
    %c0_i32_0 = arith.constant 0 : i32
    %c0_i32_1 = arith.constant 0 : i32
    return %c0_i32, %c0_i32_0 : i32, i32
  }
  func.func @transform_4(%arg0: i32) -> (i32, i32, i32) {
    %c0_i32 = arith.constant 0 : i32
    %c0_i32_0 = arith.constant 0 : i32
    %c0_i32_1 = arith.constant 0 : i32
    return %arg0, %c0_i32, %c0_i32_0 : i32, i32, i32
  }
}

</mosaic_0001>

<bundles_post_ra>
// kernel: patch_merging.1
= control target key start
LH: loop header
LB: loop body
LE: loop exit
PB: predicated region body
PF: predicated region fallthrough
CT: control target
= control target key end

     0   :  { %s1015_s15 = smov 0   ;;  %s1544_s0 = inlined_call_operand.vmem [shape: f32[16,16,16], index: 0, kind: input, shape index: {}]   ;;  %s1545_s1 = inlined_call_operand.vmem [shape: f32[1,16], index: 1, kind: input, shape index: {}]   ;;  %s1546_s2 = inlined_call_operand.vmem [shape: f32[1,16], index: 2, kind: input, shape index: {}]   ;;  %s1547_s3 = inlined_call_operand.vmem [shape: f32[8,16], index: 3, kind: input, shape index: {}]   ;;  %s1548_s4 = inlined_call_operand.vmem [shape: f32[16,8,16], index: 4, kind: output, shape index: {}]  }
   0x1 LB: > { %s894_s16 = sadd.s32 4294967295, %s987_s15   ;;  %p898_p0 = scmp.ge.s32.totalorder %s987_s15, 1  ;;  %s987_s15 = sphi %s1015_s15, %s14_s15  }
   0x2   : > { %p164_p1 = scmp.lt.s32.totalorder %s987_s15, 3 }
   0x4   : > { %p165_p2 = pnand %p898_p0, %p164_p1 }
   0x5   : > { %s899_s17 = sshll.u32 (!%p165_p2), %s894_s16, 3 }
   0x6   : > { %168 = sbr.rel (%p165_p2) target bundleno = 371 (0x173), region = 36  ;;  %p192_p3 = scmp.lt.s32.totalorder (!%p165_p2), %s899_s17, 15 }
   0xb   : > { %s1562_s17 = smov (!%p192_p3, %s899_s17), 15  ;;  %vm215_vm0 = vcmask 130048  }
   0xc   : > { %s935_s18 = sshll.u32 %s1562_s17, 4  ;;  %s903_s28 = sshll.u32 %s1562_s17, 3 }
   0xd   : > { %s1029_s21 = scalar_lea.vmem %s1544_s0, %s935_s18  ;;  %s202_s5 = scalar_lea.vmem %s1548_s4, %s903_s28 }
   0xe   : > { %v1032_v0 = vld [vmem:[%s1029_s21 + $0x30] sm:$0xff]  ;;  %v1035_v1 = vld [vmem:[%s1029_s21 + $0x28] sm:$0xff]  ;;  %v1038_v2 = vld [vmem:[%s1029_s21 + $0x20] sm:$0xff] }
   0xf   : > { %v456_v3 = vsel %vm215_vm0, %v1032_v0, 0.0  ;;  %v382_v4 = vsel %vm215_vm0, %v1035_v1, 0.0  ;;  %v379_v5 = vsel %vm215_vm0, %v1038_v2, 0.0  ;;  %v1047_v6 = vld [vmem:[%s1029_s21 + $0x38] sm:$0xff]  ;;  %v388_v8 = vmul.f32 %v1035_v1, %v1035_v1  ;;  %v1062_v14 = vld [vmem:[%s1029_s21 + $0x8] sm:$0xff]  ;;  %v1074_v20 = vld [vmem:[%s1029_s21] sm:$0xff] }
  0x10   : > { %457 = vadd.xlane.f32.xlu2 %v456_v3  ;;  %383 = vadd.xlane.f32.xlu0 %v382_v4  ;;  %v465_v7 = vmul.f32 %v1047_v6, %v1047_v6  ;;  %v459_v10 = vsel %vm215_vm0, %v1047_v6, 0.0  ;;  %v387_v12 = vmul.f32 %v1038_v2, %v1038_v2  ;;  %v464_v13 = vmul.f32 %v1032_v0, %v1032_v0  ;;  %v1071_v19 = vld [vmem:[%s1029_s21 + $0x18] sm:$0xff]  ;;  %v1082_v24 = vld [vmem:[%s1029_s21 + $0x10] sm:$0xff]  ;;  %v1085_v25 = vld [vmem:[%s1029_s21 + $0x68] sm:$0xff] }
  0x11   : > { %380 = vadd.xlane.f32.xlu1 %v379_v5  ;;  %v392_v11 = vsel %vm215_vm0, %v388_v8, 0.0  ;;  %v219_v16 = vsel %vm215_vm0, %v1062_v14, 0.0  ;;  %v232_v18 = vmul.f32 %v1062_v14, %v1062_v14  ;;  %v305_v21 = vsel %vm215_vm0, %v1071_v19, 0.0  ;;  %v1097_v31 = vld [vmem:[%s1029_s21 + $0x78] sm:$0xff]  ;;  %v1106_v36 = vld [vmem:[%s1029_s21 + $0x60] sm:$0xff]  ;;  %v1109_v37 = vld [vmem:[%s1029_s21 + $0x70] sm:$0xff] }
  0x12   : > { %v469_v9 = vsel %vm215_vm0, %v465_v7, 0.0  ;;  %v389_v15 = vsel %vm215_vm0, %v387_v12, 0.0  ;;  %v466_v17 = vsel %vm215_vm0, %v464_v13, 0.0  ;;  %v216_v23 = vsel %vm215_vm0, %v1074_v20, 0.0  ;;  %v1128_v48 = vld [vmem:[%s1029_s21 + $0x48] sm:$0xff]  ;;  %v1131_v49 = vld [vmem:[%s1029_s21 + $0x40] sm:$0xff] }
  0x13   : > { %v236_v22 = vsel %vm215_vm0, %v232_v18, 0.0  ;;  %v311_v26 = vmul.f32 %v1071_v19, %v1071_v19  ;;  %v302_v27 = vsel %vm215_vm0, %v1082_v24, 0.0  ;;  %v690_v28 = vsel %vm215_vm0, %v1085_v25, 0.0  ;;  %v1134_v50 = vld [vmem:[%s1029_s21 + $0x58] sm:$0xff]  ;;  %v1147_v56 = vld [vmem:[%s1029_s21 + $0x50] sm:$0xff] }
  0x14   : > { %v310_v30 = vmul.f32 %v1082_v24, %v1082_v24  ;;  %v231_v32 = vmul.f32 %v1074_v20, %v1074_v20  ;;  %v767_v33 = vsel %vm215_vm0, %v1097_v31, 0.0  ;;  %v696_v38 = vmul.f32 %v1085_v25, %v1085_v25 }
  0x15   : > { %v315_v29 = vsel %vm215_vm0, %v311_v26, 0.0  ;;  %v687_v39 = vsel %vm215_vm0, %v1106_v36, 0.0  ;;  %v764_v40 = vsel %vm215_vm0, %v1109_v37, 0.0  ;;  %v773_v42 = vmul.f32 %v1097_v31, %v1097_v31 }
  0x16   : > { %v312_v34 = vsel %vm215_vm0, %v310_v30, 0.0  ;;  %v233_v35 = vsel %vm215_vm0, %v231_v32, 0.0  ;;  %v700_v41 = vsel %vm215_vm0, %v696_v38, 0.0  ;;  %v772_v43 = vmul.f32 %v1109_v37, %v1109_v37 }
  0x17   : > { %v695_v44 = vmul.f32 %v1106_v36, %v1106_v36  ;;  %v777_v45 = vsel %vm215_vm0, %v773_v42, 0.0  ;;  %v536_v51 = vsel %vm215_vm0, %v1128_v48, 0.0  ;;  %v533_v52 = vsel %vm215_vm0, %v1131_v49, 0.0 }
  0x18   : > { %470 = vadd.xlane.f32.xlu2 %v469_v9  ;;  %460 = vadd.xlane.f32.xlu0 %v459_v10  ;;  %v774_v46 = vsel %vm215_vm0, %v772_v43, 0.0  ;;  %v613_v53 = vsel %vm215_vm0, %v1134_v50, 0.0  ;;  %v542_v54 = vmul.f32 %v1128_v48, %v1128_v48  ;;  %v619_v55 = vmul.f32 %v1134_v50, %v1134_v50 }
  0x19   : > { %393 = vadd.xlane.f32.xlu1 %v392_v11  ;;  %v697_v47 = vsel %vm215_vm0, %v695_v44, 0.0  ;;  %v610_v59 = vsel %vm215_vm0, %v1147_v56, 0.0  ;;  %v541_v60 = vmul.f32 %v1131_v49, %v1131_v49  ;;  %v618_v61 = vmul.f32 %v1147_v56, %v1147_v56 }
  0x1a   : > { %v546_v57 = vsel %vm215_vm0, %v542_v54, 0.0  ;;  %v623_v58 = vsel %vm215_vm0, %v619_v55, 0.0  ;;  %v989_v3 = vmov 16.0  }
  0x1b   : > { %v543_v62 = vsel %vm215_vm0, %v541_v60, 0.0  ;;  %v620_v63 = vsel %vm215_vm0, %v618_v61, 0.0  ;;  %947 = vrcp.f32 %v989_v3 }
  0x20   : > { %390 = vadd.xlane.f32.xlu0 %v389_v15  ;;  %220 = vadd.xlane.f32.xlu2 %v219_v16 }
  0x21   : > { %467 = vadd.xlane.f32.xlu1 %v466_v17  ;;  %v948_v4 = vpop.eup %947 }
  0x22   : > { %v223_v5 = vmul.f32 16.0, %v948_v4  ;;  %vm227_vm1 = vweird.f32 %v948_v4 }
  0x24   : > { %v224_v7 = vsub.f32 1.0, %v223_v5 }
  0x26   : > { %v225_v8 = vmul.f32 %v948_v4, %v224_v7 }
  0x28   : > { %306 = vadd.xlane.f32.xlu0 %v305_v21  ;;  %237 = vadd.xlane.f32.xlu2 %v236_v22  ;;  %v226_v9 = vadd.f32 %v948_v4, %v225_v8 }
  0x29   : > { %217 = vadd.xlane.f32.xlu1 %v216_v23 }
  0x2a   : > { %v1159_v13 = vsel %vm227_vm1, %v948_v4, %v226_v9 }
  0x30   : > { %303 = vadd.xlane.f32.xlu0 %v302_v27  ;;  %691 = vadd.xlane.f32.xlu2 %v690_v28 }
  0x31   : > { %316 = vadd.xlane.f32.xlu1 %v315_v29 }
  0x38   : > { %768 = vadd.xlane.f32.xlu0 %v767_v33  ;;  %313 = vadd.xlane.f32.xlu2 %v312_v34 }
  0x39   : > { %234 = vadd.xlane.f32.xlu1 %v233_v35 }
  0x40   : > { %688 = vadd.xlane.f32.xlu0 %v687_v39  ;;  %765 = vadd.xlane.f32.xlu2 %v764_v40 }
  0x41   : > { %701 = vadd.xlane.f32.xlu1 %v700_v41 }
  0x48   : > { %778 = vadd.xlane.f32.xlu0 %v777_v45  ;;  %775 = vadd.xlane.f32.xlu2 %v774_v46 }
  0x49   : > { %698 = vadd.xlane.f32.xlu1 %v697_v47 }
  0x50   : > { %537 = vadd.xlane.f32.xlu0 %v536_v51  ;;  %534 = vadd.xlane.f32.xlu2 %v533_v52 }
  0x51   : > { %614 = vadd.xlane.f32.xlu1 %v613_v53 }
  0x58   : > { %547 = vadd.xlane.f32.xlu0 %v546_v57  ;;  %624 = vadd.xlane.f32.xlu2 %v623_v58 }
  0x59   : > { %611 = vadd.xlane.f32.xlu1 %v610_v59 }
  0x60   : > { %544 = vadd.xlane.f32.xlu0 %v543_v62 }
  0x61   : > { %621 = vadd.xlane.f32.xlu1 %v620_v63 }
  0x83   : > { %v458_v10 = vpop.xlane.xlu2 %457  ;;  %v384_v11 = vpop.xlane.xlu0 %383 }
  0x84   : > { %v381_v12 = vpop.xlane.xlu1 %380  ;;  %v1162_v15 = vmul.f32 %v384_v11, %v1159_v13  ;;  %v1177_v32 = vmul.f32 %v458_v10, %v1159_v13 }
  0x85   : > { %v1174_v29 = vmul.f32 %v381_v12, %v1159_v13 }
  0x86   : > { %v398_v23 = vmul.f32 %v1162_v15, %v1162_v15  ;;  %v474_v42 = vmul.f32 %v1177_v32, %v1177_v32 }
  0x87   : > { %v397_v39 = vmul.f32 %v1174_v29, %v1174_v29 }
  0x8b   : > { %v471_v16 = vpop.xlane.xlu2 %470  ;;  %v461_v17 = vpop.xlane.xlu0 %460 }
  0x8c   : > { %v473_v18 = vmul.f32 %v471_v16, %v1159_v13  ;;  %v1166_v21 = vmul.f32 %v461_v17, %v1159_v13  ;;  %v394_v22 = vpop.xlane.xlu1 %393 }
  0x8d   : > { %v396_v26 = vmul.f32 %v394_v22, %v1159_v13 }
  0x8e   : > { %v475_v27 = vmul.f32 %v1166_v21, %v1166_v21 }
  0x8f   : > { %v400_v28 = vsub.f32 %v396_v26, %v398_v23 }
  0x90   : > { %v477_v30 = vsub.f32 %v473_v18, %v475_v27 }
  0x91   : > { %v404_v33 = vadd.f32 1e-05, %v400_v28 }
  0x92   : > { %v481_v34 = vadd.f32 1e-05, %v477_v30  ;;  %v478_v30 = vsub.f32 %v1032_v0, %v1177_v32  ;;  %v1234_v0 = vld [vmem:[%s1545_s1] ss:$0 sm:$0xff]  ;;  %v401_v32 = vsub.f32 %v1038_v2, %v1174_v29 }
  0x93   : > { %949 = vrsqrt.f32 %v404_v33  ;;  %v391_v35 = vpop.xlane.xlu0 %390  ;;  %v221_v38 = vpop.xlane.xlu2 %220  ;;  %vm421_vm4 = vweird.f32 %v404_v33 }
  0x94   : > { %951 = vrsqrt.f32 %v481_v34  ;;  %v395_v40 = vmul.f32 %v391_v35, %v1159_v13  ;;  %v468_v41 = vpop.xlane.xlu1 %467  ;;  %v1186_v45 = vmul.f32 %v1159_v13, %v221_v38  ;;  %vm498_vm6 = vweird.f32 %v481_v34 }
  0x95   : > { %v472_v43 = vmul.f32 %v468_v41, %v1159_v13 }
  0x96   : > { %v399_v44 = vsub.f32 %v395_v40, %v397_v39  ;;  %v242_v55 = vmul.f32 %v1186_v45, %v1186_v45 }
  0x97   : > { %v476_v46 = vsub.f32 %v472_v43, %v474_v42  ;;  %v479_v42 = vsub.f32 %v1047_v6, %v1166_v21 }
  0x98   : > { %v1188_v47 = vadd.f32 1e-05, %v399_v44 }
  0x99   : > { %v950_v51 = vpop.eup %949  ;;  %v1190_v52 = vadd.f32 1e-05, %v476_v46 }
  0x9a   : > { %v952_v53 = vpop.eup %951  ;;  %v416_v54 = vmul.f32 %v950_v51, %v404_v33  ;;  %953 = vrsqrt.f32 %v1188_v47  ;;  %vm422_vm2 = vweird.f32 %v950_v51  ;;  %v402_v33 = vsub.f32 %v1035_v1, %v1162_v15 }
  0x9b   : > { %v493_v57 = vmul.f32 %v952_v53, %v481_v34  ;;  %955 = vrsqrt.f32 %v1190_v52  ;;  %v307_v58 = vpop.xlane.xlu0 %306  ;;  %v238_v59 = vpop.xlane.xlu2 %237  ;;  %vm499_vm3 = vweird.f32 %v952_v53  ;;  %vm1214_vm5 = vmor %vm421_vm4, %vm422_vm2  ;;  %vm411_vm10 = vweird.f32 %v1188_v47 }
  0x9c   : > { %v417_v60 = vmul.f32 %v950_v51, %v416_v54  ;;  %v240_v61 = vmul.f32 %v238_v59, %v1159_v13  ;;  %v218_v62 = vpop.xlane.xlu1 %217  ;;  %v1200_v9 = vmul.f32 %v307_v58, %v1159_v13  ;;  %vm1226_vm7 = vmor %vm498_vm6, %vm499_vm3  ;;  %vm488_vm11 = vweird.f32 %v1190_v52 }
  0x9d   : > { %v494_v63 = vmul.f32 %v952_v53, %v493_v57  ;;  %v1245_v44 = vmul.f32 %v1159_v13, %v218_v62 }
  0x9e   : > { %v418_v3 = vmul.f32 0.5, %v417_v60  ;;  %v244_v4 = vsub.f32 %v240_v61, %v242_v55  ;;  %v321_v38 = vmul.f32 %v1200_v9, %v1200_v9 }
  0x9f   : > { %v495_v5 = vmul.f32 0.5, %v494_v63 }
  0xa0   : > { %v1197_v7 = vpop.eup %953  ;;  %v419_v8 = vsub.f32 1.5, %v418_v3  ;;  %v1202_v10 = vadd.f32 1e-05, %v244_v4  ;;  %v241_v3 = vmul.f32 %v1245_v44, %v1245_v44 }
  0xa1   : > { %v1204_v11 = vpop.eup %955  ;;  %v406_v12 = vmul.f32 %v1197_v7, %v1188_v47  ;;  %v496_v16 = vsub.f32 1.5, %v495_v5  ;;  %vm412_vm8 = vweird.f32 %v1197_v7 }
  0xa2   : > { %v483_v17 = vmul.f32 %v1204_v11, %v1190_v52  ;;  %957 = vrsqrt.f32 %v1202_v10  ;;  %v420_v26 = vmul.f32 %v950_v51, %v419_v8  ;;  %vm489_vm9 = vweird.f32 %v1204_v11  ;;  %vm1268_vm12 = vmor %vm411_vm10, %vm412_vm8 }
  0xa3   : > { %v407_v18 = vmul.f32 %v1197_v7, %v406_v12  ;;  %v304_v22 = vpop.xlane.xlu0 %303  ;;  %v1212_v23 = vpop.xlane.xlu2 %691  ;;  %v497_v28 = vmul.f32 %v952_v53, %v496_v16  ;;  %vm490_vm13 = vmor %vm488_vm11, %vm489_vm9  ;;  %vm265_vm15 = vweird.f32 %v1202_v10 }
  0xa4   : > { %v484_v35 = vmul.f32 %v1204_v11, %v483_v17  ;;  %v317_v39 = vpop.xlane.xlu1 %316  ;;  %v424_v1 = vsel %vm1214_vm5, %v950_v51, %v420_v26  ;;  %v1251_v51 = vld [vmem:[%s1546_s2] ss:$0 sm:$0xff]  ;;  %v1255_v2 = vmul.f32 %v304_v22, %v1159_v13 }
  0xa5   : > { %v408_v41 = vmul.f32 0.5, %v407_v18  ;;  %v319_v34 = vmul.f32 %v317_v39, %v1159_v13  ;;  %v501_v15 = vsel %vm1226_vm7, %v952_v53, %v497_v28  ;;  %v426_v53 = vmul.f32 %v424_v1, %v402_v33 }
  0xa6   : > { %v485_v43 = vmul.f32 0.5, %v484_v35  ;;  %v503_v6 = vmul.f32 %v501_v15, %v479_v42  ;;  %v320_v5 = vmul.f32 %v1255_v2, %v1255_v2  ;;  %v246_v15 = vsub.f32 %v1062_v14, %v1186_v45 }
  0xa7   : > { %v409_v46 = vsub.f32 1.5, %v408_v41  ;;  %v323_v54 = vsub.f32 %v319_v34, %v321_v38  ;;  %v428_v58 = vmul.f32 %v1234_v0, %v426_v53  ;;  %v1294_v34 = vmul.f32 %v1212_v23, %v1159_v13 }
  0xa8   : > { %v958_v55 = vpop.eup %957  ;;  %v486_v57 = vsub.f32 1.5, %v485_v43  ;;  %v505_v60 = vmul.f32 %v1234_v0, %v503_v6 }
  0xa9   : > { %v260_v21 = vmul.f32 %v958_v55, %v1202_v10  ;;  %v1258_v29 = vadd.f32 1e-05, %v323_v54  ;;  %v410_v59 = vmul.f32 %v1197_v7, %v409_v46  ;;  %v430_v47 = vadd.f32 %v1251_v51, %v428_v58 }
  0xaa   : > { %v487_v61 = vmul.f32 %v1204_v11, %v486_v57  ;;  %v507_v16 = vadd.f32 %v1251_v51, %v505_v60  ;;  %vm266_vm14 = vweird.f32 %v958_v55  ;;  %v706_v14 = vmul.f32 %v1294_v34, %v1294_v34 }
  0xab   : > { %v261_v63 = vmul.f32 %v958_v55, %v260_v21  ;;  %959 = vrsqrt.f32 %v1258_v29  ;;  %v769_v4 = vpop.xlane.xlu0 %768  ;;  %v314_v52 = vpop.xlane.xlu2 %313  ;;  %v414_v17 = vsel %vm1268_vm12, %v1197_v7, %v410_v59  ;;  %445 = vmatpush.msra.mxu2 %v430_v47  ;;  %vm267_vm1 = vmor %vm265_vm15, %vm266_vm14  ;;  %vm344_vm3 = vweird.f32 %v1258_v29 }
  0xac   : > { %v318_v8 = vmul.f32 %v314_v52, %v1159_v13  ;;  %v235_v12 = vpop.xlane.xlu1 %234  ;;  %v425_v26 = vmul.f32 %v414_v17, %v401_v32  ;;  %v491_v27 = vsel %vm490_vm13, %v1204_v11, %v487_v61  ;;  %522 = vmatpush.msra.mxu3 %v507_v16  ;;  %v1312_v21 = vmul.f32 %v769_v4, %v1159_v13 }
  0xad   : > { %v262_v18 = vmul.f32 0.5, %v261_v63  ;;  %v239_v22 = vmul.f32 %v235_v12, %v1159_v13  ;;  %v502_v33 = vmul.f32 %v491_v27, %v478_v30 }
  0xae   : > { %v322_v28 = vsub.f32 %v318_v8, %v320_v5  ;;  %v427_v39 = vmul.f32 %v1234_v0, %v425_v26  ;;  %v325_v8 = vsub.f32 %v1071_v19, %v1200_v9  ;;  %v783_v12 = vmul.f32 %v1312_v21, %v1312_v21 }
  0xaf   : > { %v263_v35 = vsub.f32 1.5, %v262_v18  ;;  %v243_v38 = vsub.f32 %v239_v22, %v241_v3  ;;  %v504_v7 = vmul.f32 %v1234_v0, %v502_v33 }
  0xb0   : > { %v1289_v40 = vadd.f32 1e-05, %v322_v28  ;;  %v429_v30 = vadd.f32 %v1251_v51, %v427_v39 }
  0xb1   : > { %v960_v41 = vpop.eup %959  ;;  %v1296_v11 = vadd.f32 1e-05, %v243_v38  ;;  %v264_v1 = vmul.f32 %v958_v55, %v263_v35  ;;  %v506_v10 = vadd.f32 %v1251_v51, %v504_v7 }
  0xb2   : > { %v339_v32 = vmul.f32 %v960_v41, %v1258_v29  ;;  %961 = vrsqrt.f32 %v1289_v40  ;;  %446 = vmatpush.msra.mxu2 %v429_v30  ;;  %vm345_vm2 = vweird.f32 %v960_v41  ;;  %vm334_vm7 = vweird.f32 %v1289_v40 }
  0xb3   : > { %963 = vrsqrt.f32 %v1296_v11  ;;  %v689_v23 = vpop.xlane.xlu0 %688  ;;  %v766_v42 = vpop.xlane.xlu2 %765  ;;  %v268_v43 = vsel %vm267_vm1, %v958_v55, %v264_v1  ;;  %523 = vmatpush.msra.mxu3 %v506_v10  ;;  %vm346_vm4 = vmor %vm344_vm3, %vm345_vm2  ;;  %vm255_vm9 = vweird.f32 %v1296_v11 }
  0xb4   : > { %v340_v46 = vmul.f32 %v960_v41, %v339_v32  ;;  %v702_v54 = vpop.xlane.xlu1 %701  ;;  %v270_v53 = vmul.f32 %v268_v43, %v246_v15  ;;  %v1309_v6 = vmul.f32 %v766_v42, %v1159_v13  ;;  %v1322_v63 = vmul.f32 %v689_v23, %v1159_v13 }
  0xb5   : > { %v704_v45 = vmul.f32 %v702_v54, %v1159_v13 }
  0xb6   : > { %v341_v57 = vmul.f32 0.5, %v340_v46  ;;  %v272_v59 = vmul.f32 %v1234_v0, %v270_v53  ;;  %v782_v52 = vmul.f32 %v1309_v6, %v1309_v6  ;;  %v705_v28 = vmul.f32 %v1322_v63, %v1322_v63 }
  0xb7   : > { %v708_v58 = vsub.f32 %v704_v45, %v706_v14 }
  0xb8   : > { %v1315_v55 = vpop.eup %961  ;;  %v342_v60 = vsub.f32 1.5, %v341_v57  ;;  %v274_v47 = vadd.f32 %v1251_v51, %v272_v59  ;;  %v245_v59 = vsub.f32 %v1074_v20, %v1245_v44 }
  0xb9   : > { %v1317_v61 = vpop.eup %963  ;;  %v329_v62 = vmul.f32 %v1315_v55, %v1289_v40  ;;  %v1324_v3 = vadd.f32 1e-05, %v708_v58  ;;  %vm335_vm5 = vweird.f32 %v1315_v55 }
  0xba   : > { %v250_v4 = vmul.f32 %v1317_v61, %v1296_v11  ;;  %v343_v5 = vmul.f32 %v960_v41, %v342_v60  ;;  %292 = vmatpush.msra.mxu0 %v274_v47  ;;  %vm256_vm6 = vweird.f32 %v1317_v61  ;;  %vm1362_vm8 = vmor %vm334_vm7, %vm335_vm5 }
  0xbb   : > { %v330_v16 = vmul.f32 %v1315_v55, %v329_v62  ;;  %965 = vrsqrt.f32 %v1324_v3  ;;  %v779_v17 = vpop.xlane.xlu0 %778  ;;  %v776_v29 = vpop.xlane.xlu2 %775  ;;  %vm257_vm10 = vmor %vm255_vm9, %vm256_vm6  ;;  %v324_v62 = vsub.f32 %v1082_v24, %v1255_v2  ;;  %vm729_vm11 = vweird.f32 %v1324_v3 }
  0xbc   : > { %v251_v18 = vmul.f32 %v1317_v61, %v250_v4  ;;  %v781_v22 = vmul.f32 %v779_v17, %v1159_v13  ;;  %v780_v26 = vmul.f32 %v776_v29, %v1159_v13  ;;  %v699_v27 = vpop.xlane.xlu1 %698  ;;  %v347_v19 = vsel %vm346_vm4, %v960_v41, %v343_v5 }
  0xbd   : > { %v331_v9 = vmul.f32 0.5, %v330_v16  ;;  %v703_v33 = vmul.f32 %v699_v27, %v1159_v13  ;;  %v349_v35 = vmul.f32 %v347_v19, %v325_v8  ;;  %v787_v5 = vsub.f32 %v1097_v31, %v1312_v21 }
  0xbe   : > { %v252_v38 = vmul.f32 0.5, %v251_v18  ;;  %v785_v39 = vsub.f32 %v781_v22, %v783_v12  ;;  %v784_v7 = vsub.f32 %v780_v26, %v782_v52  ;;  %v710_v52 = vsub.f32 %v1085_v25, %v1294_v34  ;;  %v1397_v25 = vld [vmem:[%s1547_s3] sm:$0xff] }
  0xbf   : > { %v332_v30 = vsub.f32 1.5, %v331_v9  ;;  %v707_v1 = vsub.f32 %v703_v33, %v705_v28  ;;  %v351_v15 = vmul.f32 %v1234_v0, %v349_v35  ;;  %911 = vmatmul.msk.f32.vlgmr.msra.gmra.mxu2 %vm215_vm0, %v1397_v25  ;;  %915 = vmatmul.msk.f32.vlgmr.msra.gmra.mxu3 %vm215_vm0, %v1397_v25 }
  0xc0   : > { %v253_v32 = vsub.f32 1.5, %v252_v38  ;;  %v1347_v10 = vadd.f32 1e-05, %v785_v39  ;;  %v1349_v41 = vadd.f32 1e-05, %v784_v7 }
  0xc1   : > { %v1351_v23 = vpop.eup %965  ;;  %v1354_v42 = vadd.f32 1e-05, %v707_v1  ;;  %v353_v43 = vadd.f32 %v1251_v51, %v351_v15  ;;  %v333_v46 = vmul.f32 %v1315_v55, %v332_v30 }
  0xc2   : > { %v724_v54 = vmul.f32 %v1351_v23, %v1324_v3  ;;  %967 = vrsqrt.f32 %v1347_v10  ;;  %v254_v57 = vmul.f32 %v1317_v61, %v253_v32  ;;  %vm730_vm12 = vweird.f32 %v1351_v23 }
  0xc3   : > { %969 = vrsqrt.f32 %v1349_v41  ;;  %368 = vmatpush.msra.mxu1 %v353_v43  ;;  %v538_v14 = vpop.xlane.xlu0 %537  ;;  %v535_v45 = vpop.xlane.xlu2 %534  ;;  %v337_v11 = vsel %vm1362_vm8, %v1315_v55, %v333_v46  ;;  %v709_v55 = vsub.f32 %v1106_v36, %v1322_v63  ;;  %vm806_vm13 = vweird.f32 %v1347_v10  ;;  %vm731_vm14 = vmor %vm729_vm11, %vm730_vm12 }
  0xc4   : > { %v725_v40 = vmul.f32 %v1351_v23, %v724_v54  ;;  %971 = vrsqrt.f32 %v1354_v42  ;;  %v615_v58 = vpop.xlane.xlu1 %614  ;;  %v258_v60 = vsel %vm257_vm10, %v1317_v61, %v254_v57  ;;  %v1380_v4 = vmul.f32 %v538_v14, %v1159_v13 }
  0xc5   : > { %v1387_v20 = vmul.f32 %v615_v58, %v1159_v13  ;;  %v269_v44 = vmul.f32 %v258_v60, %v245_v59  ;;  %v348_v2 = vmul.f32 %v337_v11, %v324_v62  ;;  %v1434_v32 = vmul.f32 %v535_v45, %v1159_v13 }
  0xc6   : > { %v726_v47 = vmul.f32 0.5, %v725_v40  ;;  %v552_v29 = vmul.f32 %v1380_v4, %v1380_v4  ;;  %vm796_vm4 = vweird.f32 %v1349_v41  ;;  %vm719_vm5 = vweird.f32 %v1354_v42 }
  0xc7   : > { %v271_v12 = vmul.f32 %v1234_v0, %v269_v44  ;;  %v350_v18 = vmul.f32 %v1234_v0, %v348_v2  ;;  %v629_v19 = vmul.f32 %v1387_v20, %v1387_v20  ;;  %v551_v2 = vmul.f32 %v1434_v32, %v1434_v32 }
  0xc8   : > { %v1389_v61 = vpop.eup %967  ;;  %v727_v24 = vsub.f32 1.5, %v726_v47 }
  0xc9   : > { %v1399_v34 = vpop.eup %969  ;;  %v801_v8 = vmul.f32 %v1389_v61, %v1347_v10  ;;  %v273_v9 = vadd.f32 %v1251_v51, %v271_v12  ;;  %v352_v38 = vadd.f32 %v1251_v51, %v350_v18  ;;  %vm807_vm15 = vweird.f32 %v1389_v61 }
  0xca   : > { %v1410_v16 = vpop.eup %971  ;;  %v791_v17 = vmul.f32 %v1399_v34, %v1349_v41  ;;  %v728_v22 = vmul.f32 %v1351_v23, %v727_v24  ;;  %vm797_vm1 = vweird.f32 %v1399_v34  ;;  %vm1455_vm3 = vmor %vm806_vm13, %vm807_vm15  ;;  %v786_v24 = vsub.f32 %v1109_v37, %v1309_v6 }
  0xcb   : > { %v802_v26 = vmul.f32 %v1389_v61, %v801_v8  ;;  %v714_v27 = vmul.f32 %v1410_v16, %v1354_v42  ;;  %v548_v28 = vpop.xlane.xlu0 %547  ;;  %v625_v33 = vpop.xlane.xlu2 %624  ;;  %293 = vmatpush.msra.mxu0 %v273_v9  ;;  %369 = vmatpush.msra.mxu1 %v352_v38  ;;  %vm720_vm2 = vweird.f32 %v1410_v16  ;;  %vm1465_vm6 = vmor %vm796_vm4, %vm797_vm1 }
  0xcc   : > { %v792_v35 = vmul.f32 %v1399_v34, %v791_v17  ;;  %v550_v39 = vmul.f32 %v548_v28, %v1159_v13  ;;  %v627_v7 = vmul.f32 %v625_v33, %v1159_v13  ;;  %v612_v30 = vpop.xlane.xlu1 %611  ;;  %v732_v43 = vsel %vm731_vm14, %v1351_v23, %v728_v22  ;;  %904 = vmatmul.msk.f32.vlgmr.msra.gmra.mxu0 %vm215_vm0, %v1397_v25  ;;  %vm721_vm7 = vmor %vm719_vm5, %vm720_vm2 }
  0xcd   : > { %v803_v1 = vmul.f32 0.5, %v802_v26  ;;  %v715_v15 = vmul.f32 %v1410_v16, %v714_v27  ;;  %v734_v53 = vmul.f32 %v732_v43, %v710_v52  ;;  %907 = vmatmul.msk.f32.vlgmr.msra.gmra.mxu1 %vm215_vm0, %v1397_v25  ;;  %v1450_v60 = vmul.f32 %v612_v30, %v1159_v13 }
  0xce   : > { %v793_v3 = vmul.f32 0.5, %v792_v35  ;;  %v554_v46 = vsub.f32 %v550_v39, %v552_v29  ;;  %v631_v54 = vsub.f32 %v627_v7, %v629_v19 }
  0xcf   : > { %v804_v14 = vsub.f32 1.5, %v803_v1  ;;  %v716_v57 = vmul.f32 0.5, %v715_v15  ;;  %v736_v58 = vmul.f32 %v1234_v0, %v734_v53 }
  0xd0   : > { %v794_v45 = vsub.f32 1.5, %v793_v3  ;;  %v1443_v40 = vadd.f32 1e-05, %v554_v46  ;;  %v1445_v23 = vadd.f32 1e-05, %v631_v54  ;;  %v556_v46 = vsub.f32 %v1128_v48, %v1380_v4 }
  0xd1   : > { %v717_v59 = vsub.f32 1.5, %v716_v57  ;;  %v805_v11 = vmul.f32 %v1389_v61, %v804_v14  ;;  %v738_v47 = vadd.f32 %v1251_v51, %v736_v58  ;;  %v633_v14 = vsub.f32 %v1134_v50, %v1387_v20 }
  0xd2   : > { %973 = vrsqrt.f32 %v1443_v40  ;;  %v795_v42 = vmul.f32 %v1399_v34, %v794_v45  ;;  %vm575_vm10 = vweird.f32 %v1443_v40  ;;  %vm652_vm12 = vweird.f32 %v1445_v23 }
  0xd3   : > { %975 = vrsqrt.f32 %v1445_v23  ;;  %v545_v10 = vpop.xlane.xlu0 %544  ;;  %v718_v44 = vmul.f32 %v1410_v16, %v717_v59  ;;  %v809_v41 = vsel %vm1455_vm3, %v1389_v61, %v805_v11  ;;  %753 = vmatpush.msrb.mxu2 %v738_v47  ;;  %v628_v61 = vmul.f32 %v1450_v60, %v1450_v60 }
  0xd4   : > { %v549_v8 = vmul.f32 %v545_v10, %v1159_v13  ;;  %v622_v12 = vpop.xlane.xlu1 %621  ;;  %v811_v17 = vmul.f32 %v809_v41, %v787_v5  ;;  %v799_v6 = vsel %vm1465_vm6, %v1399_v34, %v795_v42  ;;  %v632_v42 = vsub.f32 %v1147_v56, %v1450_v60 }
  0xd5   : > { %v626_v29 = vmul.f32 %v622_v12, %v1159_v13  ;;  %v722_v37 = vsel %vm721_vm7, %v1410_v16, %v718_v44  ;;  %v810_v31 = vmul.f32 %v799_v6, %v786_v24  ;;  %v555_v44 = vsub.f32 %v1131_v49, %v1434_v32 }
  0xd6   : > { %v553_v18 = vsub.f32 %v549_v8, %v551_v2  ;;  %v733_v22 = vmul.f32 %v722_v37, %v709_v55  ;;  %v813_v26 = vmul.f32 %v1234_v0, %v811_v17 }
  0xd7   : > { %v630_v21 = vsub.f32 %v626_v29, %v628_v61  ;;  %v812_v16 = vmul.f32 %v1234_v0, %v810_v31 }
  0xd8   : > { %v974_v5 = vpop.eup %973  ;;  %v557_v27 = vadd.f32 1e-05, %v553_v18  ;;  %v735_v19 = vmul.f32 %v1234_v0, %v733_v22  ;;  %v815_v13 = vadd.f32 %v1251_v51, %v813_v26 }
  0xd9   : > { %v976_v9 = vpop.eup %975  ;;  %v570_v34 = vmul.f32 %v974_v5, %v1443_v40  ;;  %v634_v28 = vadd.f32 1e-05, %v630_v21  ;;  %v814_v35 = vadd.f32 %v1251_v51, %v812_v16  ;;  %vm576_vm8 = vweird.f32 %v974_v5 }
  0xda   : > { %v647_v33 = vmul.f32 %v976_v9, %v1445_v23  ;;  %977 = vrsqrt.f32 %v557_v27  ;;  %830 = vmatpush.msrb.mxu3 %v815_v13  ;;  %v737_v63 = vadd.f32 %v1251_v51, %v735_v19  ;;  %vm653_vm9 = vweird.f32 %v976_v9  ;;  %vm577_vm11 = vmor %vm575_vm10, %vm576_vm8 }
  0xdb   : > { %v571_v36 = vmul.f32 %v974_v5, %v570_v34  ;;  %979 = vrsqrt.f32 %v634_v28  ;;  %vm654_vm13 = vmor %vm652_vm12, %vm653_vm9  ;;  %vm565_vm1 = vweird.f32 %v557_v27  ;;  %vm642_vm3 = vweird.f32 %v634_v28 }
  0xdc   : > { %v648_v55 = vmul.f32 %v976_v9, %v647_v33  ;;  %754 = vmatpush.msrb.mxu2 %v737_v63  ;;  %831 = vmatpush.msrb.mxu3 %v814_v35 }
  0xdd   : > { %v572_v38 = vmul.f32 0.5, %v571_v36  ;;  %927 = vmatmul.msk.f32.vlgmr.msrb.gmra.mxu2 %vm215_vm0, %v1397_v25  ;;  %931 = vmatmul.msk.f32.vlgmr.msrb.gmra.mxu3 %vm215_vm0, %v1397_v25 }
  0xde   : > { %v649_v39 = vmul.f32 0.5, %v648_v55 }
  0xdf   : > { %v573_v7 = vsub.f32 1.5, %v572_v38 }
  0xe0   : > { %v978_v30 = vpop.eup %977  ;;  %v650_v1 = vsub.f32 1.5, %v649_v39 }
  0xe1   : > { %v980_v15 = vpop.eup %979  ;;  %v560_v43 = vmul.f32 %v978_v30, %v557_v27  ;;  %v574_v3 = vmul.f32 %v974_v5, %v573_v7  ;;  %vm566_vm14 = vweird.f32 %v978_v30 }
  0xe2   : > { %v637_v54 = vmul.f32 %v980_v15, %v634_v28  ;;  %v651_v53 = vmul.f32 %v976_v9, %v650_v1  ;;  %vm643_vm15 = vweird.f32 %v980_v15  ;;  %vm567_vm2 = vmor %vm565_vm1, %vm566_vm14 }
  0xe3   : > { %v561_v57 = vmul.f32 %v978_v30, %v560_v43  ;;  %v578_v45 = vsel %vm577_vm11, %v974_v5, %v574_v3  ;;  %vm644_vm4 = vmor %vm642_vm3, %vm643_vm15 }
  0xe4   : > { %v638_v58 = vmul.f32 %v980_v15, %v637_v54  ;;  %v580_v59 = vmul.f32 %v578_v45, %v556_v46  ;;  %v655_v11 = vsel %vm654_vm13, %v976_v9, %v651_v53 }
  0xe5   : > { %v562_v40 = vmul.f32 0.5, %v561_v57  ;;  %v657_v62 = vmul.f32 %v655_v11, %v633_v14 }
  0xe6   : > { %v639_v47 = vmul.f32 0.5, %v638_v58  ;;  %v582_v52 = vmul.f32 %v1234_v0, %v580_v59 }
  0xe7   : > { %v563_v48 = vsub.f32 1.5, %v562_v40  ;;  %v659_v4 = vmul.f32 %v1234_v0, %v657_v62 }
  0xe8   : > { %v640_v23 = vsub.f32 1.5, %v639_v47  ;;  %v584_v10 = vadd.f32 %v1251_v51, %v582_v52 }
  0xe9   : > { %v661_v50 = vadd.f32 %v1251_v51, %v659_v4  ;;  %v564_v20 = vmul.f32 %v978_v30, %v563_v48 }
  0xea   : > { %599 = vmatpush.msrb.mxu0 %v584_v10  ;;  %v641_v41 = vmul.f32 %v980_v15, %v640_v23 }
  0xeb   : > { %676 = vmatpush.msrb.mxu1 %v661_v50  ;;  %v568_v24 = vsel %vm567_vm2, %v978_v30, %v564_v20 }
  0xec   : > { %v579_v2 = vmul.f32 %v568_v24, %v555_v44  ;;  %v645_v8 = vsel %vm644_vm4, %v980_v15, %v641_v41 }
  0xed   : > { %v656_v12 = vmul.f32 %v645_v8, %v632_v42 }
  0xee   : > { %v581_v17 = vmul.f32 %v1234_v0, %v579_v2 }
  0xef   : > { %v658_v61 = vmul.f32 %v1234_v0, %v656_v12 }
  0xf0   : > { %v583_v49 = vadd.f32 %v1251_v51, %v581_v17 }
  0xf1   : > { %v660_v32 = vadd.f32 %v1251_v51, %v658_v61 }
  0xf2   : > { %600 = vmatpush.msrb.mxu0 %v583_v49 }
  0xf3   : > { %677 = vmatpush.msrb.mxu1 %v660_v32  ;;  %919 = vmatmul.msk.f32.vlgmr.msrb.gmra.mxu0 %vm215_vm0, %v1397_v25 }
  0xf4   : > { %923 = vmatmul.msk.f32.vlgmr.msrb.gmra.mxu1 %vm215_vm0, %v1397_v25 }
 0x142   : > { %v448_v60 = vpop.f32.mrf.mxu2  ;;  %v525_v51 = vpop.f32.mrf.mxu3 }
 0x143   : > { %912 = vst.msk [vmem:[%s202_s5 + $0x10] sm:$0xff] %vm215_vm0, %v448_v60 }
 0x144   : > { %916 = vst.msk [vmem:[%s202_s5 + $0x18] sm:$0xff] %vm215_vm0, %v525_v51 }
 0x149   : > { %v295_v56 = vpop.f32.mrf.mxu0 }
 0x14a   : > { %298 = vst.msk [vmem:[%s202_s5] sm:$0xff] %vm215_vm0, %v295_v56  ;;  %v371_v0 = vpop.f32.mrf.mxu1 }
 0x14b   : > { %908 = vst.msk [vmem:[%s202_s5 + $0x8] sm:$0xff] %vm215_vm0, %v371_v0 }
 0x160   : > { %v756_v29 = vpop.f32.mrf.mxu2  ;;  %v833_v25 = vpop.f32.mrf.mxu3 }
 0x161   : > { %928 = vst.msk [vmem:[%s202_s5 + $0x30] sm:$0xff] %vm215_vm0, %v756_v29 }
 0x162   : > { %932 = vst.msk [vmem:[%s202_s5 + $0x38] sm:$0xff] %vm215_vm0, %v833_v25 }
 0x170   : > { %v602_v37 = vpop.f32.mrf.mxu0 }
 0x171   : > { %920 = vst.msk [vmem:[%s202_s5 + $0x20] sm:$0xff] %vm215_vm0, %v602_v37  ;;  %v679_v6 = vpop.f32.mrf.mxu1 }
 0x172   : > { %924 = vst.msk [vmem:[%s202_s5 + $0x28] sm:$0xff] %vm215_vm0, %v679_v6 }
 0x173 PF: > { %s14_s15 = sadd.s32 1, %s987_s15  }
 0x174   : > { %p11_p4 = scmp.ge.s32.totalorder %s14_s15, 4  }
 0x176   :  { %13 = sbr.rel (!%p11_p4) target bundleno = 1 (0x1), region = 80 }

</bundles_post_ra>
